<compile_context>
chip_gen: v7x
topology: tpu7x:2x2x1
jax: 0.10.0
libtpu: 0.0.40
codegen_flags: <defaults>
</compile_context>

<pallas_src>
import jax
import jax.numpy as jnp
from jax import lax
from jax.experimental import pallas as pl
from jax.experimental.pallas import tpu as pltpu

_BN_EPS = 1e-5


def _att_kernel(in_ref, w1_ref, wpsi_ref, b1_ref, bpsi_ref, out_ref):
    # in_ref:  (K1, TS)  with K1 = 9*Fg + Fl     (im2col(g) stacked over x)
    # w1_ref:  (F_int, K1)   wpsi_ref: (OC, F_int)
    # b1_ref:  (F_int, 1)    bpsi_ref: (OC, 1)
    # out_ref: (OC, TS)      TS = spatial tile (multiple of 128 or full H*W)
    pre = jnp.dot(w1_ref[...], in_ref[...],
                  preferred_element_type=jnp.float32) + b1_ref[...]
    psi = jnp.maximum(pre, 0.0)
    att = jnp.dot(wpsi_ref[...], psi,
                  preferred_element_type=jnp.float32) + bpsi_ref[...]
    out_ref[...] = jax.nn.sigmoid(att).astype(out_ref.dtype)


def _fold_bn(gamma, beta, mean, var, conv_bias, eps=_BN_EPS):
    # BN(conv + b) = s * conv + (s * (b - mean) + beta),  s = gamma/sqrt(var+eps)
    s = gamma / jnp.sqrt(var + eps)
    t = s * (conv_bias - mean) + beta
    return s, t


def _pick_spatial_tile(hw, max_tile=512):
    """Largest multiple of 128 that divides hw and is <= max_tile (else hw)."""
    if hw % 128 != 0:
        return hw
    t = min(hw, (max_tile // 128) * 128)
    while t > 0 and hw % t != 0:
        t -= 128
    return t if t > 0 else hw


def att_block_v3(g_nchw, x_nchw, params, spatial_tile=None):
    B, Fg, H, W = g_nchw.shape
    Fl = x_nchw.shape[1]
    F_int = params["wg"].shape[0]
    OC = params["wpsi"].shape[0]
    HW = H * W
    K1 = 9 * Fg + Fl

    ts = spatial_tile if spatial_tile is not None else _pick_spatial_tile(HW)
    assert HW % ts == 0
    n_s = HW // ts

    # --- im2col for the 3x3 'same' conv, tap-major rows, then stack x below
    #     it so the first layer is a single fused GEMM: (B, 9*Fg + Fl, H*W).
    g_pad = jnp.pad(g_nchw, ((0, 0), (0, 0), (1, 1), (1, 1)))
    cols = [g_pad[:, :, dy:dy + H, dx:dx + W].reshape(B, Fg, HW)
            for dy in range(3) for dx in range(3)]
    cols.append(x_nchw.reshape(B, Fl, HW))
    in_flat = jnp.concatenate(cols, axis=1)                  # (B, K1, HW)

    # --- fold conv bias + BatchNorm into per-channel scale/shift, then fold
    #     the scale into the GEMM weights (row = output channel).
    sg, tg = _fold_bn(*params["bn_g"], params["bg"])
    sx, tx = _fold_bn(*params["bn_x"], params["bx"])
    sp, tp = _fold_bn(*params["bn_psi"], params["bpsi"])

    wg_mat = jnp.transpose(params["wg"], (0, 2, 3, 1)).reshape(F_int, 9 * Fg)
    wg_mat = wg_mat * sg[:, None]                            # (F_int, 9*Fg)
    wx_mat = params["wx"][:, :, 0, 0] * sx[:, None]          # (F_int, Fl)
    w1_mat = jnp.concatenate([wg_mat, wx_mat], axis=1)       # (F_int, K1)
    wpsi_mat = params["wpsi"][:, :, 0, 0] * sp[:, None]      # (OC, F_int)
    b1 = (tg + tx).reshape(F_int, 1)                         # pre-ReLU bias
    b_psi = tp.reshape(OC, 1)                                # psi-path bias

    out_flat = pl.pallas_call(
        _att_kernel,
        out_shape=jax.ShapeDtypeStruct((B, OC, HW), jnp.float32),
        grid_spec=pltpu.PrefetchScalarGridSpec(
            num_scalar_prefetch=0,
            grid=(B, n_s),
            in_specs=[
                pl.BlockSpec((None, K1, ts), lambda b, s: (b, 0, s)),
                pl.BlockSpec((F_int, K1), lambda b, s: (0, 0)),
                pl.BlockSpec((OC, F_int), lambda b, s: (0, 0)),
                pl.BlockSpec((F_int, 1), lambda b, s: (0, 0)),
                pl.BlockSpec((OC, 1), lambda b, s: (0, 0)),
            ],
            out_specs=pl.BlockSpec((None, OC, ts), lambda b, s: (b, 0, s)),
        ),
        compiler_params=pltpu.CompilerParams(
            dimension_semantics=("parallel", "parallel")),
    )(in_flat, w1_mat, wpsi_mat, b1, b_psi)

    # Lane-dense (B, OC, H*W) -> NCHW is a free reshape (no transpose pass).
    return out_flat.reshape(B, OC, H, W)


def _reference(g, x, params, eps=_BN_EPS):
    """Pure-JAX reference of the PyTorch forward (eval-mode BN), NCHW."""
    def bn(y, gamma, beta, mean, var):
        c = lambda v: v[None, :, None, None]
        return (y - c(mean)) / jnp.sqrt(c(var) + eps) * c(gamma) + c(beta)

    dn = ('NCHW', 'OIHW', 'NCHW')
    g1 = lax.conv_general_dilated(g, params["wg"], (1, 1), 'SAME',
                                  dimension_numbers=dn)
    g1 = bn(g1 + params["bg"][None, :, None, None], *params["bn_g"])
    x1 = lax.conv_general_dilated(x, params["wx"], (1, 1), 'VALID',
                                  dimension_numbers=dn)
    x1 = bn(x1 + params["bx"][None, :, None, None], *params["bn_x"])
    psi = jnp.maximum(g1 + x1, 0.0)
    att = lax.conv_general_dilated(psi, params["wpsi"], (1, 1), 'VALID',
                                   dimension_numbers=dn)
    att = bn(att + params["bpsi"][None, :, None, None], *params["bn_psi"])
    return jax.nn.sigmoid(att)


def _init_params(key, F_g, F_l, F_int, OC):
    ks = jax.random.split(key, 12)

    def bn_params(k, c):
        k1, k2, k3, k4 = jax.random.split(k, 4)
        gamma = 1.0 + 0.1 * jax.random.normal(k1, (c,), jnp.float32)
        beta = 0.1 * jax.random.normal(k2, (c,), jnp.float32)
        mean = 0.1 * jax.random.normal(k3, (c,), jnp.float32)
        var = 1.0 + 0.5 * jax.random.uniform(k4, (c,), jnp.float32)
        return (gamma, beta, mean, var)

    return {
        "wg": 0.1 * jax.random.normal(ks[0], (F_int, F_g, 3, 3), jnp.float32),
        "bg": 0.1 * jax.random.normal(ks[1], (F_int,), jnp.float32),
        "bn_g": bn_params(ks[2], F_int),
        "wx": 0.1 * jax.random.normal(ks[3], (F_int, F_l, 1, 1), jnp.float32),
        "bx": 0.1 * jax.random.normal(ks[4], (F_int,), jnp.float32),
        "bn_x": bn_params(ks[5], F_int),
        "wpsi": 0.1 * jax.random.normal(ks[6], (OC, F_int, 1, 1), jnp.float32),
        "bpsi": 0.1 * jax.random.normal(ks[7], (OC,), jnp.float32),
        "bn_psi": bn_params(ks[8], OC),
    }


if __name__ == "__main__":
    B, F_g, F_l, F_int, OC = 2, 4, 6, 8, 1
    H = W = 16

    key = jax.random.PRNGKey(0)
    kg, kx, kp = jax.random.split(key, 3)
    g = jax.random.normal(kg, (B, F_g, H, W), jnp.float32)   # NCHW, like PyTorch
    x = jax.random.normal(kx, (B, F_l, H, W), jnp.float32)
    params = _init_params(kp, F_g, F_l, F_int, OC)

    # spatial_tile=128 exercises the (batch, spatial) parallel grid.
    att = att_block_v3(g, x, params, spatial_tile=128)
    att = jax.block_until_ready(att)

    ref = jax.block_until_ready(_reference(g, x, params))
    assert att.shape == (B, OC, H, W), att.shape
    assert jnp.allclose(att, ref, rtol=1e-4, atol=1e-5), (
        float(jnp.max(jnp.abs(att - ref))))

    print("KERNEL_OK")
</pallas_src>

<mosaic_0001>
module attributes {stable_mosaic.version = 11 : i64} {
  func.func @_att_kernel(%arg0: i32, %arg1: i32, %arg2: memref<1x42x128xf32, #tpu.memory_space<vmem>>, %arg3: memref<8x42xf32, #tpu.memory_space<vmem>>, %arg4: memref<1x8xf32, #tpu.memory_space<vmem>>, %arg5: memref<8x1xf32, #tpu.memory_space<vmem>>, %arg6: memref<1x1xf32, #tpu.memory_space<vmem>>, %arg7: memref<1x1x128xf32, #tpu.memory_space<vmem>>) attributes {dimension_semantics = [#tpu.dimension_semantics<parallel>, #tpu.dimension_semantics<parallel>], iteration_bounds = array<i64: 2, 2>, scalar_prefetch = 0 : i64, scratch_operands = 0 : i64, tpu.core_type = #tpu.core_type<tc>, window_params = [{transform_indices = @transform_0, window_bounds = array<i64: 1, 42, 128>}, {pipeline_mode = #tpu.pipeline_mode<synchronous>, transform_indices = @transform_1, window_bounds = array<i64: 8, 42>}, {pipeline_mode = #tpu.pipeline_mode<synchronous>, transform_indices = @transform_2, window_bounds = array<i64: 1, 8>}, {pipeline_mode = #tpu.pipeline_mode<synchronous>, transform_indices = @transform_3, window_bounds = array<i64: 8, 1>}, {pipeline_mode = #tpu.pipeline_mode<synchronous>, transform_indices = @transform_4, window_bounds = array<i64: 1, 1>}, {transform_indices = @transform_5, window_bounds = array<i64: 1, 1, 128>}]} {
    %c0 = arith.constant 0 : index
    %c0_0 = arith.constant 0 : index
    %0 = vector.load %arg3[%c0, %c0_0] : memref<8x42xf32, #tpu.memory_space<vmem>>, vector<8x42xf32>
    %c0_1 = arith.constant 0 : index
    %c0_2 = arith.constant 0 : index
    %c0_3 = arith.constant 0 : index
    %1 = vector.load %arg2[%c0_1, %c0_2, %c0_3] : memref<1x42x128xf32, #tpu.memory_space<vmem>>, vector<1x42x128xf32>
    %2 = vector.shape_cast %1 : vector<1x42x128xf32> to vector<42x128xf32>
    %cst = arith.constant dense<0.000000e+00> : vector<8x128xf32>
    %3 = tpu.matmul %0, %2, %cst {dimension_numbers = #tpu.dot_dimension_numbers<[1], [0], [0], [1], [0, 0, 1, 1], [], []>} : vector<8x42xf32>, vector<42x128xf32>, vector<8x128xf32> -> vector<8x128xf32>
    %c0_4 = arith.constant 0 : index
    %c0_5 = arith.constant 0 : index
    %4 = vector.load %arg5[%c0_4, %c0_5] : memref<8x1xf32, #tpu.memory_space<vmem>>, vector<8x1xf32>
    %5 = vector.broadcast %4 : vector<8x1xf32> to vector<8x128xf32>
    %6 = arith.addf %3, %5 : vector<8x128xf32>
    %cst_6 = arith.constant 0.000000e+00 : f32
    %7 = vector.broadcast %cst_6 : f32 to vector<8x128xf32>
    %8 = arith.maximumf %6, %7 : vector<8x128xf32>
    %c0_7 = arith.constant 0 : index
    %c0_8 = arith.constant 0 : index
    %9 = vector.load %arg4[%c0_7, %c0_8] : memref<1x8xf32, #tpu.memory_space<vmem>>, vector<1x8xf32>
    %cst_9 = arith.constant dense<0.000000e+00> : vector<1x128xf32>
    %10 = tpu.matmul %9, %8, %cst_9 {dimension_numbers = #tpu.dot_dimension_numbers<[1], [0], [0], [1], [0, 0, 1, 1], [], []>} : vector<1x8xf32>, vector<8x128xf32>, vector<1x128xf32> -> vector<1x128xf32>
    %c0_10 = arith.constant 0 : index
    %c0_11 = arith.constant 0 : index
    %11 = vector.load %arg6[%c0_10, %c0_11] : memref<1x1xf32, #tpu.memory_space<vmem>>, vector<1x1xf32>
    %12 = vector.broadcast %11 : vector<1x1xf32> to vector<1x128xf32>
    %13 = arith.addf %10, %12 : vector<1x128xf32>
    %14 = arith.negf %13 : vector<1x128xf32>
    %15 = math.exp %14 : vector<1x128xf32>
    %cst_12 = arith.constant 1.000000e+00 : f32
    %16 = vector.broadcast %cst_12 : f32 to vector<1x128xf32>
    %17 = arith.addf %16, %15 : vector<1x128xf32>
    %18 = arith.divf %16, %17 : vector<1x128xf32>
    %c0_13 = arith.constant 0 : index
    %c0_14 = arith.constant 0 : index
    %c0_15 = arith.constant 0 : index
    %19 = vector.load %arg7[%c0_13, %c0_14, %c0_15] : memref<1x1x128xf32, #tpu.memory_space<vmem>>, vector<1x1x128xf32>
    %20 = vector.shape_cast %19 : vector<1x1x128xf32> to vector<1x128xf32>
    %21 = vector.shape_cast %18 : vector<1x128xf32> to vector<1x1x128xf32>
    tpu.vector_store %arg7[%c0_13, %c0_14, %c0_15], %21 {strides = array<i32>} : memref<1x1x128xf32, #tpu.memory_space<vmem>>, vector<1x1x128xf32>,
    return
  }
  func.func @transform_0(%arg0: i32, %arg1: i32) -> (i32, i32, i32) {
    %c0_i32 = arith.constant 0 : i32
    %c0_i32_0 = arith.constant 0 : i32
    return %arg0, %c0_i32, %arg1 : i32, i32, i32
  }
  func.func @transform_1(%arg0: i32, %arg1: i32) -> (i32, i32) {
    %c0_i32 = arith.constant 0 : i32
    %c0_i32_0 = arith.constant 0 : i32
    %c0_i32_1 = arith.constant 0 : i32
    return %c0_i32, %c0_i32_0 : i32, i32
  }
  func.func @transform_2(%arg0: i32, %arg1: i32) -> (i32, i32) {
    %c0_i32 = arith.constant 0 : i32
    %c0_i32_0 = arith.constant 0 : i32
    %c0_i32_1 = arith.constant 0 : i32
    return %c0_i32, %c0_i32_0 : i32, i32
  }
  func.func @transform_3(%arg0: i32, %arg1: i32) -> (i32, i32) {
    %c0_i32 = arith.constant 0 : i32
    %c0_i32_0 = arith.constant 0 : i32
    %c0_i32_1 = arith.constant 0 : i32
    return %c0_i32, %c0_i32_0 : i32, i32
  }
  func.func @transform_4(%arg0: i32, %arg1: i32) -> (i32, i32) {
    %c0_i32 = arith.constant 0 : i32
    %c0_i32_0 = arith.constant 0 : i32
    %c0_i32_1 = arith.constant 0 : i32
    return %c0_i32, %c0_i32_0 : i32, i32
  }
  func.func @transform_5(%arg0: i32, %arg1: i32) -> (i32, i32, i32) {
    %c0_i32 = arith.constant 0 : i32
    %c0_i32_0 = arith.constant 0 : i32
    return %arg0, %c0_i32, %arg1 : i32, i32, i32
  }
}

</mosaic_0001>

<bundles_post_ra>
// kernel: tpu_custom_call.1
= control target key start
LH: loop header
LB: loop body
LE: loop exit
PB: predicated region body
PF: predicated region fallthrough
CT: control target
= control target key end

     0   :  { %s1001_s0 = inlined_call_operand.vmem [shape: f32[2,42,256], index: 0, kind: input, shape index: {}]   ;;  %s1002_s1 = inlined_call_operand.vmem [shape: f32[8,42], index: 1, kind: input, shape index: {}]   ;;  %s1003_s2 = inlined_call_operand.vmem [shape: f32[1,8], index: 2, kind: input, shape index: {}]   ;;  %s1004_s3 = inlined_call_operand.vmem [shape: f32[8,1], index: 3, kind: input, shape index: {}]   ;;  %s1005_s4 = inlined_call_operand.<no memory space> [shape: f32[1,1], index: 4, kind: input, shape index: {}]   ;;  %s1006_s5 = inlined_call_operand.hbm [shape: f32[2,1,256], index: 5, kind: output, shape index: {}]  }
   0x1   :  { %v10_v0 = vstv %s1005_s4 }
   0x2   :  { %11 = vst [vmem:[#allocation2] sm:$0x1] %v10_v0 }
   0x3   :  { %12 = vsyncpa [#allocation5], 0 }
   0x4   :  { %14 = vsyncpa [#allocation5 + $0x1], 0  ;;  %s843_s20 = smov 0   ;;  %s845_s21 = smov 0  }
   0x5   :  { %s847_s22 = smov 0   ;;  %s849_s23 = smov 0  }
   0x6   :  { %s851_s24 = smov 0   ;;  %s853_s25 = smov 0  }
   0x7   :  { %s855_s26 = smov 0   ;;  %s857_s27 = smov 0  }
   0x8 LB: > { %s571_s4 = sadd.s32 4294967295, %s802_s27   ;;  %s572_s28 = sadd.s32 4294967294, %s802_s27   ;;  %s802_s27 = sphi %s857_s27, %s20_s27   ;;  %s798_s26 = sphi %s855_s26, %s1016_s26   ;;  %s794_s25 = sphi %s853_s25, %s1015_s25   ;;  %s790_s24 = sphi %s851_s24, %s1014_s24   ;;  %s786_s23 = sphi %s849_s23, %s1013_s23   ;;  %s782_s22 = sphi %s847_s22, %s1012_s22   ;;  %s778_s21 = sphi %s845_s21, %s1011_s21   ;;  %s774_s20 = sphi %s843_s20, %s1010_s20  }
   0x9   : > { %s29_s29 = sadd.s32 1, %s794_s25  ;;  %s32_s30 = sadd.s32 1, %s798_s26 }
   0xa   : > { %p30_p0 = scmp.ge.s32.totalorder %s29_s29, 2  ;;  %p48_p1 = scmp.ne.s32.totalorder %s782_s22, %s778_s21 }
   0xb   : > { %p49_p2 = scmp.eq.s32.totalorder %s802_s27, 0  ;;  %p164_p5 = scmp.eq.s32.totalorder %s571_s4, 3 }
   0xc   : > { %s1018_s29 = smov (%p30_p0, %s29_s29), 0  ;;  %s1020_s30 = smov (!%p30_p0, %s32_s30), %s798_s26 }
   0xd   : > { %s37_s6 = ssub.s32 %s794_s25, %s1018_s29  ;;  %p895_p3 = por %p49_p2, %p48_p1 }
   0xe   : > { %p34_p4 = scmp.ge.s32.totalorder %s1020_s30, 2  ;;  %p169_p6 = scmp.ne.s32.totalorder %s778_s21, %s774_s20 }
   0xf   : > { %p170_p7 = scmp.eq.s32.totalorder %s572_s28, 3  ;;  %p903_p8 = por %p164_p5, %p48_p1 }
  0x10   : > { %s1022_s30 = smov (%p34_p4, %s1020_s30), 0  ;;  %s41_s12 = sadd.s32 1, %s782_s22 }
  0x11   : > { %p907_p9 = por %p170_p7, %p169_p6  ;;  %s36_s10 = ssub.s32 %s798_s26, %s1022_s30 }
  0x12   : > { %s38_s11 = sor.u32 %s37_s6, %s36_s10  ;;  %p574_p11 = scmp.ge.s32.totalorder %s802_s27, 4 }
  0x13   : > { %p39_p10 = scmp.eq.s32.totalorder %s38_s11, 0 }
  0x14   : > { %198 = sbr.rel (%p574_p11) target bundleno = 37 (0x25), region = 32 }
  0x15   : > { %s915_s13 = scalar_select %p39_p10, %s782_s22, %s41_s12  }
  0x1b   : > { %201 = sbr.rel (!%p895_p3) target bundleno = 37 (0x25), region = 36  ;;  %s203_s14 = sand.u32 (%p895_p3), 1, %s782_s22  }
  0x1c   : > { %s625_s15 = smul.u32 (%p895_p3), 12, %s798_s26 }
  0x1d   : > { %s624_s16 = smul.u32 (%p895_p3), 48, %s203_s14 }
  0x1e   : > { %s207_s17 = sadd.s32 (%p895_p3), %s794_s25, %s625_s15 }
  0x1f   : > { %s575_s18 = sshll.u32 (%p895_p3), %s207_s17, 3  ;;  %s205_s6 = scalar_lea.vmem (%p895_p3), [#allocation3], %s624_s16 }
  0x20   : > { %s209_s28 = scalar_lea.vmem (%p895_p3), %s1001_s0, %s575_s18 }
  0x21   : > { %v247_v1 = vld [vmem:[%s209_s28] sm:$0xff] (%p895_p3)  ;;  %v249_v2 = vld [vmem:[%s209_s28 + $0x10] sm:$0xff] (%p895_p3) }
  0x22   : > { %v251_v3 = vld [vmem:[%s209_s28 + $0x20] sm:$0xff]  ;;  %248 = vst [vmem:[%s205_s6] sm:$0xff] %v247_v1  ;;  %250 = vst [vmem:[%s205_s6 + $0x8] sm:$0xff] %v249_v2  ;;  %v253_v4 = vld [vmem:[%s209_s28 + $0x30] sm:$0xff] }
  0x23   : > { %252 = vst [vmem:[%s205_s6 + $0x10] sm:$0xff] %v251_v3  ;;  %v255_v5 = vld [vmem:[%s209_s28 + $0x40] sm:$0xff]  ;;  %v257_v6 = vld [vmem:[%s209_s28 + $0x50] sm:$0xff]  ;;  %254 = vst [vmem:[%s205_s6 + $0x18] sm:$0xff] %v253_v4 }
  0x24   : > { %256 = vst [vmem:[%s205_s6 + $0x20] sm:$0xff] %v255_v5  ;;  %258 = vst [vmem:[%s205_s6 + $0x28] sm:$0xff] %v257_v6 }
  0x25 PF: > { %p576_p12 = scmp.ge.s32.totalorder %s802_s27, 1  ;;  %p263_p13 = scmp.lt.s32.totalorder %s802_s27, 5 }
  0x27   : > { %p264_p0 = pnand %p576_p12, %p263_p13 }
  0x28   : > { %s929_s7 = sand.u32 (!%p264_p0), 1, %s778_s21   ;;  %v804_v7 = vmov (!%p264_p0), 0.0|0.0   ;;  %v303_v8 = vld [vmem:[%s1004_s3] sm:$0xff] (!%p264_p0)  ;;  %vm805_vm0 = vmmov (!%p264_p0), 0   ;;  %v806_v9 = vmov (!%p264_p0), 0.0   ;;  %v807_v10 = vmov (!%p264_p0), 0  }
  0x29   : > { %267 = sbr.rel (%p264_p0) target bundleno = 530 (0x212), region = 74  ;;  %614 = vmatprep.subr.bf16.mxu0 (!%p264_p0), %v804_v7  ;;  %606 = vmatprep.mubr.msk.f32.mxu0 (!%p264_p0), %vm805_vm0, %v806_v9  ;;  %v389_v11 = vld [vmem:[#allocation2] sm:$0x1] (!%p264_p0)  ;;  %vm313_vm1 = vcmask (!%p264_p0), 1041408   ;;  %vm808_vm2 = vmmov (!%p264_p0), 1   ;;  %vm309_vm4 = vcmask (!%p264_p0), 343040   ;;  %v395_v28 = vlaneseq (!%p264_p0) }
  0x2a   : > { %s626_s10 = smul.u32 (!%p264_p0), 48, %s929_s7  ;;  %703 = vset.pattern.permute.xlu0 (!%p264_p0), %v807_v10  ;;  %609 = vmatprep.subr.mxu1 (!%p264_p0), %v806_v9  ;;  %vm622_vm3 = vmpackc.low (!%p264_p0), %vm313_vm1, %vm808_vm2  ;;  %v296_v21 = vld [vmem:[%s1002_s1] sm:$0xff] (!%p264_p0)  ;;  %vm399_vm5 = vcmask (!%p264_p0), 64512   ;;  %s581_s19 = sshll.u32 (!%p264_p0), %s790_s24, 1 }
  0x2b   : > { %306 = vperm.xlu0 (!%p264_p0), %703, %v303_v8   ;;  %611 = vmatprep.mubr.msk.f32.mxu1 (!%p264_p0), %vm805_vm0, %v806_v9  ;;  %v388_v27 = vld [vmem:[%s1003_s2] sm:$0x1] (!%p264_p0)  ;;  %v396_v29 = vshrl.u32 (!%p264_p0), %v395_v28, 7  ;;  %s491_s4 = sadd.s32 (!%p264_p0), %s786_s23, %s581_s19  ;;  %s295_s6 = scalar_lea.vmem (!%p264_p0), [#allocation4], %s929_s7 }
  0x2c   : > { %s272_s14 = scalar_lea.vmem (!%p264_p0), [#allocation3], %s626_s10  ;;  %s582_s28 = sshll.u32 (!%p264_p0), %s491_s4, 4 }
  0x2d   : > { %v297_v12 = vld [vmem:[%s272_s14] sm:$0xff] (!%p264_p0)  ;;  %v298_v13 = vld [vmem:[%s272_s14 + $0x8] sm:$0xff] (!%p264_p0)  ;;  %v299_v14 = vld [vmem:[%s272_s14 + $0x10] sm:$0xff] (!%p264_p0)  ;;  %v397_v30 = vsub.s32 (!%p264_p0), 0, %v396_v29  ;;  %s495_s10 = sshll.u32 (!%p264_p0), %s295_s6, 4  ;;  %s481_s15 = scalar_lea.sflag (!%p264_p0), [#allocation5], %s929_s7  ;;  %s949_s10 = int_to_ptr.vmem [resolvable:$true] %s495_s10 }
  0x2e   : > { %v615_v15 = vpack.c.bf16 (!%p264_p0), %v298_v13, %v297_v12  ;;  %v300_v16 = vld [vmem:[%s272_s14 + $0x18] sm:$0xff] (!%p264_p0)  ;;  %v301_v18 = vld [vmem:[%s272_s14 + $0x20] sm:$0xff] (!%p264_p0)  ;;  %v302_v19 = vld [vmem:[%s272_s14 + $0x28] sm:$0x3] (!%p264_p0)  ;;  %s947_s14 = scalar_lea.hbm (!%p264_p0), %s1006_s5, %s582_s28  ;;  %s708_s16 = scalar_lea.vmem (!%p264_p0), %s949_s10, 16 }
  0x2f   : > { %v618_v17 = vpack.c.bf16 (!%p264_p0), %v300_v16, %v299_v14  ;;  %392 = vperm.xlu0 (!%p264_p0), %703, %v389_v11   ;;  %v621_v20 = vpack.c.bf16 (!%p264_p0), %v302_v19, %v301_v18  ;;  %p709_p1 = scmp.ne.s32.totalorder (!%p264_p0), %s949_s10, %s708_s16  ;;  %s809_s23 = smov (!%p264_p0), [#allocation4]  }
  0x30   : > { %616 = vmatpush3.bf16.msra.mxu0 %v615_v15  ;;  %s712_s24 = sshll.u32 %s809_s23, 4  ;;  %s713_s24 = int_to_ptr.vmem [resolvable:$false] %s712_s24 }
  0x31   : > { %617 = vmatprep.subr.bf16.mxu0 %v804_v7  ;;  %p710_p2 = pnand %p709_p1, %p903_p8  ;;  %s714_s17 = scalar_lea.vmem %s713_s24, 32 }
  0x32   : > { %p715_p4 = scmp.lt.s32.totalorder %s949_s10, %s713_s24  ;;  %p716_p5 = scmp.lt.s32.totalorder %s714_s17, %s708_s16 }
  0x33   : > { %p711_p3 = pneg %p710_p2 }
  0x34   : > { %619 = vmatpush3.bf16.msra.mxu0 %v618_v17  ;;  %p717_p6 = por %p716_p5, %p715_p4 }
  0x35   : > { %620 = vmatprep.subr.bf16.mxu0 %v804_v7 }
  0x36   : > { %p718_p7 = pnand %p717_p6, %p711_p3 }
  0x38   : > { %623 = vmatpush3.bf16.msk.msra.mxu0 %vm622_vm3, %v621_v20 }
  0x3b   : > { %607 = vmatmul.mubr.msk.f32.vlgmr.msra.gmra.mrb[0].mxu0 %vm309_vm4, %v296_v21 }
  0xaa   : > { %v307_v22 = vpop.permute.xlu0 %306 }
  0xae   : > { %v393_v31 = vpop.permute.xlu0 %392 }
  0xaf   : > { %v398_v32 = vrot.slane %v393_v31, %v397_v30 }
 0x10e   : > { %v383_v23 = vpop.f32.mrb[0].mxu0 }
 0x10f   : > { %v384_v24 = vadd.f32 %v383_v23, %v307_v22  ;;  %v608_v25 = vpop.f32.mrb[1].mxu0 }
 0x111   : > { %v387_v26 = vmax.f32 %v384_v24, 0.0 }
 0x113   : > { %610 = vmatpush3.msra.mxu1 %v387_v26 }
 0x114   : > { %612 = vmatmul.mubr.msk.f32.vlgmr.msra.gmra.mrb[0].mxu1 %vm399_vm5, %v388_v27 }
 0x1e7   : > { %v469_v33 = vpop.f32.mrb[0].mxu1 }
 0x1e8   : > { %v470_v34 = vadd.f32 %v469_v33, %v398_v32  ;;  %v613_v35 = vpop.f32.mrb[1].mxu1 }
 0x1ea   : > { %v580_v36 = vmul.f32 -1.442695, %v470_v34 }
 0x1ec   : > { %704 = vpow2.f32 %v580_v36 }
 0x1f6   : > { %v705_v37 = vpop.eup %704 }
 0x1f7   : > { %v476_v38 = vadd.f32 1.0, %v705_v37 }
 0x1f9   : > { %706 = vrcp.f32 %v476_v38 }
 0x203   : > { %v707_v39 = vpop.eup %706 }
 0x204   : > { %479 = vst [vmem:[%s295_s6] sm:$0x1] %v707_v39 }
 0x205   : > { %721 = shalt.err (!%p718_p7)
}
 0x206   : > { %s722_s7 = scalar_lea.hbm %s947_s14, 16  ;;  %s726_s4 = scalar_lea.hbm %s1006_s5, 64 }
 0x207   : > { %p723_p10 = scmp.ne.s32.totalorder %s947_s14, %s722_s7  ;;  %p727_p13 = scmp.lt.u32.totalorder %s947_s14, %s1006_s5 }
 0x208   : > { %p728_p0 = scmp.lt.u32.totalorder %s726_s4, %s722_s7  ;;  %p730_p2 = scmp.lt.u32.totalorder %s722_s7, %s947_s14 }
 0x209   : > { %p724_p11 = pnand %p723_p10, %p903_p8 }
 0x20a   : > { %p729_p1 = por %p728_p0, %p727_p13 }
 0x20b   : > { %p725_p12 = pneg %p724_p11 }
 0x20c   : > { %p731_p3 = por %p730_p2, %p729_p1 }
 0x20e   : > { %p732_p4 = pnand %p731_p3, %p725_p12 }
 0x210   : > { %735 = shalt.err (!%p732_p4)
}
 0x211   : > { %627 = dma.vmem_to_hbm [thread:$0]  (%p903_p8), %s949_s10, 16, %s947_s14, %s481_s15  }
 0x212 PF: > { %p633_p5 = scmp.ge.s32.totalorder %s802_s27, 2  ;;  %s507_s11 = sand.u32 1, %s774_s20  }
 0x213   : > { %s508_s12 = scalar_lea.sflag [#allocation5], %s507_s11 }
 0x214   : > { %p630_p6 = pnand %p633_p5, %p907_p9 }
 0x216   : > { %769 = dma.done.wait (!%p630_p6), %s508_s12, 16  }
 0x217   : > { %771 = vsyncadd (!%p630_p6), %s508_s12, 4294967280  ;;  %s20_s27 = sadd.s32 1, %s802_s27   ;;  %s1010_s20 = smov %s778_s21 }
 0x218   : > { %p17_p7 = scmp.ge.s32.totalorder %s20_s27, 6   ;;  %s1011_s21 = smov %s782_s22 }
 0x219   : > { %s1012_s22 = smov %s915_s13  ;;  %s1013_s23 = smov %s794_s25 }
 0x21a   : > { %s1014_s24 = smov %s798_s26  ;;  %s1015_s25 = smov %s1018_s29 }
 0x21b   : > { %s1016_s26 = smov %s1022_s30  ;;  %19 = sbr.rel (!%p17_p7) target bundleno = 8 (0x8), region = 118 }
 0x222   :  { %512 = vsyncpa [#allocation5], 1 }
 0x223   :  { %514 = vsyncpa [#allocation5 + $0x1], 1 }

</bundles_post_ra>
